<compile_context>
chip_gen: v5e
topology: v5e:2x2
jax: 0.10.0
libtpu: 0.0.40
codegen_flags: <defaults>
</compile_context>

<pallas_src>
import functools

import numpy as np
import jax
import jax.numpy as jnp
from jax.experimental import pallas as pl
from jax.experimental.pallas import tpu as pltpu

EPSILON = 1e-10
LANE = 128
SUBLANE = 8


def _round_up(x: int, m: int) -> int:
    return (x + m - 1) // m * m


def _vmem_capacity_bytes(default: int = 64 << 20) -> int:
    """Per-core VMEM capacity (v7x: 64 MiB, v5e/v6e: 128 MiB); conservative default."""
    try:
        info = pltpu.get_tpu_info()
        return int(getattr(info, "vmem_capacity_bytes", default))
    except Exception:
        return default


def _rir_kernel(y_ref, x_ref, fwdy_ref, fwdx_ref, invr_ref, invi_ref, o_ref, *,
                f_tile, n_freq, n_freq_pad, epsilon, x_highest):
    """Frequency-domain deconvolution for one (batch tile, frequency slab).

    y_ref   : (tb, n_y)          f32  observed signal tile
    x_ref   : (tb, n_x_pad)      f32  estimated source tile (zero-padded to 8)
    fwdy_ref: (n_y, 2*f_tile)    bf16 forward rfft slab  [cos_j | -sin_j]
    fwdx_ref: (n_x_pad, 2*f_tile) f32 forward rfft slab for x (high precision)
    invr_ref: (f_tile, n_k_pad)  bf16 truncated-irfft synthesis (real part)
    invi_ref: (f_tile, n_k_pad)  bf16 truncated-irfft synthesis (imag part)
    o_ref   : (tb, n_k_pad)      f32  RIR taps, accumulated over frequency slabs
    """
    j = pl.program_id(1)
    ft = f_tile
    tb = y_ref.shape[0]

    # ---- forward DFT of this frequency slab --------------------------------
    # Y path: single bf16 MXU pass (Y only appears linearly in the result).
    yspec = jnp.dot(y_ref[...].astype(jnp.bfloat16), fwdy_ref[...],
                    preferred_element_type=jnp.float32)            # (tb, 2ft)
    # X path: explicitly high precision -- 1/|X|^2 amplifies rounding of
    # near-zero spectral bins, so this matmul must not silently demote to bf16.
    x_prec = jax.lax.Precision.HIGHEST if x_highest else None
    xspec = jnp.dot(x_ref[...], fwdx_ref[...], precision=x_prec,
                    preferred_element_type=jnp.float32)            # (tb, 2ft)

    yr = yspec[:, :ft]
    yi = yspec[:, ft:]
    xr = xspec[:, :ft] + epsilon
    xi = xspec[:, ft:]

    # ---- complex division  H = Y / (X + eps) = Y * conj(Xe) / |Xe|^2 --------
    den = xr * xr + xi * xi
    if n_freq_pad != n_freq:
        # padded frequency columns: force den = 1 (numerators are exactly 0),
        # so nothing depends on eps^2 staying representable.
        col = jax.lax.broadcasted_iota(jnp.int32, (tb, ft), 1) + j * ft
        den = jnp.where(col < n_freq, den, 1.0)
    r0 = pl.reciprocal(den, approx=True)       # EUP slot
    inv = r0 * (2.0 - den * r0)                # one Newton step -> near exact
    hr = (yr * xr + yi * xi) * inv
    hi = (yi * xr - yr * xi) * inv

    # ---- truncated irfft of this slab: two bf16 MXU matmuls, no concat ------
    part = (jnp.dot(hr.astype(jnp.bfloat16), invr_ref[...],
                    preferred_element_type=jnp.float32)
            + jnp.dot(hi.astype(jnp.bfloat16), invi_ref[...],
                      preferred_element_type=jnp.float32))         # (tb, n_k_pad)

    @pl.when(j == 0)
    def _init():
        o_ref[...] = part

    @pl.when(j > 0)
    def _accum():
        o_ref[...] += part


@functools.lru_cache(maxsize=None)
def _build_bases(n_y, n_x_pad, n_k, f_tile, n_freq_pad, n_k_pad):
    """Lane-padded real-DFT bases; forward bases laid out per frequency block
    as [cos_j | -sin_j] so a (rows, 2*f_tile) BlockSpec slab is self-contained."""
    n_freq = n_y // 2 + 1
    nf = n_freq_pad // f_tile
    k = np.arange(n_freq_pad, dtype=np.float64)[None, :]

    def fwd(rows):
        n = np.arange(rows, dtype=np.float64)[:, None]
        ang = 2.0 * np.pi * n * k / n_y
        c = np.cos(ang)
        s = -np.sin(ang)                       # rfft: exp(-i w)
        c[:, n_freq:] = 0.0
        s[:, n_freq:] = 0.0
        out = np.empty((rows, 2 * n_freq_pad), dtype=np.float32)
        for jb in range(nf):                   # block layout [c_j | s_j]
            lo, hi = jb * f_tile, (jb + 1) * f_tile
            out[:, 2 * lo:2 * lo + f_tile] = c[:, lo:hi]
            out[:, 2 * lo + f_tile:2 * hi] = s[:, lo:hi]
        return out

    fwd_y = fwd(n_y)
    fwd_x = fwd(n_x_pad)   # rows >= n_x multiply zero-padded x -> harmless

    # irfft synthesis:  h[m] = (1/N) * sum_k w[k] * (Hr[k] cos - Hi[k] sin)
    kf = np.arange(n_freq_pad, dtype=np.float64)
    w = np.where((kf == 0) | ((n_y % 2 == 0) & (kf == n_y // 2)), 1.0, 2.0)
    w[n_freq:] = 0.0
    m = np.arange(n_k_pad, dtype=np.float64)[None, :]
    ang = 2.0 * np.pi * kf[:, None] * m / n_y
    inv_r = ((w[:, None] * np.cos(ang)) / n_y).astype(np.float32)
    inv_i = ((-w[:, None] * np.sin(ang)) / n_y).astype(np.float32)
    inv_r[:, n_k:] = 0.0
    inv_i[:, n_k:] = 0.0

    return fwd_y, fwd_x, inv_r, inv_i


@functools.partial(jax.jit, static_argnames=("epsilon", "x_highest"))
def _forward(y, x_hat, *, epsilon, x_highest):
    n_y = y.shape[-1]
    n_x = x_hat.shape[-1]
    n_k = n_y - n_x + 1
    lead = y.shape[:-1]
    assert x_hat.shape[:-1] == lead, "leading dims of y and x_hat must match"
    assert n_k >= 1, "x_hat must not be longer than y"

    b = int(np.prod(lead)) if lead else 1
    y2 = y.reshape(b, n_y).astype(jnp.float32)
    x2 = x_hat.reshape(b, n_x).astype(jnp.float32)

    n_freq = n_y // 2 + 1
    n_x_pad = _round_up(n_x, SUBLANE)       # keep x at ~n_x, not n_y
    n_k_pad = _round_up(n_k, LANE)          # lane-dense output slab

    # --- batch tiling: <=128 rows/tile, >=2 grid steps when the batch permits
    tile_b = min(128, _round_up(b, SUBLANE))
    b_pad = _round_up(b, tile_b)
    if b_pad // tile_b < 2 and b > SUBLANE:
        tile_b = _round_up(-(-b // 2), SUBLANE)   # both TensorCores get work
        b_pad = _round_up(b, tile_b)
    nb = b_pad // tile_b

    # --- frequency tiling: keep resident basis slabs inside VMEM -------------
    vmem_cap = _vmem_capacity_bytes()

    def footprint(ft):
        slab = (n_y * 2 * ft * 2            # fwd_y slab (bf16)
                + n_x_pad * 2 * ft * 4      # fwd_x slab (f32)
                + 2 * ft * n_k_pad * 2)     # inv_r + inv_i slabs (bf16)
        io = tile_b * (n_y + n_x_pad + n_k_pad) * 4
        inter = 16 * tile_b * ft * 4 + 2 * tile_b * n_k_pad * 4
        return 2 * (slab + io) + inter      # inputs/outputs double-buffered

    f_tile = _round_up(n_freq, LANE)
    budget = int(0.70 * vmem_cap)
    while f_tile > LANE and footprint(f_tile) > budget:
        f_tile = max(LANE, _round_up(f_tile // 2, LANE))
    n_freq_pad = _round_up(n_freq, f_tile)
    nf = n_freq_pad // f_tile

    # --- pad batch rows / source length --------------------------------------
    y2 = jnp.pad(y2, ((0, b_pad - b), (0, 0)))
    x2 = jnp.pad(x2, ((0, b_pad - b), (0, n_x_pad - n_x)))

    fwd_y_np, fwd_x_np, inv_r_np, inv_i_np = _build_bases(
        n_y, n_x_pad, n_k, f_tile, n_freq_pad, n_k_pad)
    fwd_y = jnp.asarray(fwd_y_np, jnp.bfloat16)   # Y path: single bf16 MXU pass
    fwd_x = jnp.asarray(fwd_x_np, jnp.float32)    # X path: full precision
    inv_r = jnp.asarray(inv_r_np, jnp.bfloat16)
    inv_i = jnp.asarray(inv_i_np, jnp.bfloat16)

    vmem_limit = int(min(int(0.85 * vmem_cap),
                         max(footprint(f_tile) + (8 << 20), 16 << 20)))

    flops = (2 * b_pad * n_y * 2 * n_freq_pad          # Y forward DFT
             + 2 * b_pad * n_x_pad * 2 * n_freq_pad    # X forward DFT
             + 2 * 2 * b_pad * n_freq_pad * n_k_pad    # truncated inverse DFT
             + 16 * b_pad * n_freq_pad)                # complex div + Newton
    basis_bytes = (fwd_y.size * 2 + fwd_x.size * 4
                   + (inv_r.size + inv_i.size) * 2)
    bytes_accessed = (b_pad * (n_y + n_x_pad) * 4      # y / x reads
                      + nb * basis_bytes               # bases re-streamed per batch tile
                      + b_pad * n_k_pad * 4)           # output writes

    kernel = functools.partial(
        _rir_kernel, f_tile=f_tile, n_freq=n_freq, n_freq_pad=n_freq_pad,
        epsilon=float(epsilon), x_highest=x_highest)

    out = pl.pallas_call(
        kernel,
        out_shape=jax.ShapeDtypeStruct((b_pad, n_k_pad), jnp.float32),
        grid=(nb, nf),
        in_specs=[
            pl.BlockSpec((tile_b, n_y), lambda i, j: (i, 0)),          # y tile
            pl.BlockSpec((tile_b, n_x_pad), lambda i, j: (i, 0)),      # x tile
            pl.BlockSpec((n_y, 2 * f_tile), lambda i, j: (0, j)),      # fwd_y slab
            pl.BlockSpec((n_x_pad, 2 * f_tile), lambda i, j: (0, j)),  # fwd_x slab
            pl.BlockSpec((f_tile, n_k_pad), lambda i, j: (j, 0)),      # inv_r slab
            pl.BlockSpec((f_tile, n_k_pad), lambda i, j: (j, 0)),      # inv_i slab
        ],
        out_specs=pl.BlockSpec((tile_b, n_k_pad), lambda i, j: (i, 0)),
        compiler_params=pltpu.CompilerParams(
            dimension_semantics=("parallel", "arbitrary"),
            vmem_limit_bytes=vmem_limit),
        cost_estimate=pl.CostEstimate(flops=flops,
                                      transcendentals=b_pad * n_freq_pad,
                                      bytes_accessed=bytes_accessed),
    )(y2, x2, fwd_y, fwd_x, inv_r, inv_i)

    return out[:b, :n_k].reshape(*lead, n_k)


def non_blind_rir_estimator(y: jax.Array, x_hat: jax.Array,
                            *, epsilon: float = EPSILON) -> jax.Array:
    """JAX/Pallas equivalent of NonBlindRIREstimator.forward."""
    try:
        return _forward(y, x_hat, epsilon=epsilon, x_highest=True)
    except Exception:
        # Fallback if this Mosaic build rejects an explicit precision attribute
        # on the X forward dot; f32 operands with default precision otherwise.
        return _forward(y, x_hat, epsilon=epsilon, x_highest=False)


def _reference(y, x_hat, epsilon=EPSILON):
    """Pure-JAX reference mirroring the PyTorch module."""
    n_y = y.shape[-1]
    n_x = x_hat.shape[-1]
    n_k = n_y - n_x + 1
    Y = jnp.fft.rfft(y, n_y)
    X = jnp.fft.rfft(x_hat, n_y)
    return jnp.fft.irfft(Y / (X + epsilon), n_y)[..., :n_k]


if __name__ == "__main__":
    key = jax.random.PRNGKey(0)
    ky, kx = jax.random.split(key)

    # batch=2, channels=4, observed length n_y=64, source length n_x=49
    # -> RIR taps n_k=16.
    y = jax.random.normal(ky, (2, 4, 64), dtype=jnp.float32)
    x_hat = jax.random.normal(kx, (2, 4, 49), dtype=jnp.float32)

    out = jax.block_until_ready(non_blind_rir_estimator(y, x_hat))
    ref = jax.block_until_ready(_reference(y, x_hat))

    err = float(jnp.max(jnp.abs(out - ref)) / (jnp.max(jnp.abs(ref)) + 1e-12))
    assert out.shape == (2, 4, 16), out.shape
    assert err < 1e-2, f"relative error too large: {err}"

    print("KERNEL_OK")
</pallas_src>

<mosaic_0001>
module attributes {stable_mosaic.version = 11 : i64} {
  func.func @_rir_kernel(%arg0: i32, %arg1: i32, %arg2: memref<8x64xf32, #tpu.memory_space<vmem>>, %arg3: memref<8x56xf32, #tpu.memory_space<vmem>>, %arg4: memref<64x256xbf16, #tpu.memory_space<vmem>>, %arg5: memref<56x256xf32, #tpu.memory_space<vmem>>, %arg6: memref<128x128xbf16, #tpu.memory_space<vmem>>, %arg7: memref<128x128xbf16, #tpu.memory_space<vmem>>, %arg8: memref<8x128xf32, #tpu.memory_space<vmem>>) attributes {dimension_semantics = [#tpu.dimension_semantics<parallel>, #tpu.dimension_semantics<arbitrary>], iteration_bounds = array<i64: 1, 1>, scalar_prefetch = 0 : i64, scratch_operands = 0 : i64, tpu.core_type = #tpu.core_type<tc>, window_params = [{transform_indices = @transform_0, window_bounds = array<i64: 8, 64>}, {transform_indices = @transform_1, window_bounds = array<i64: 8, 56>}, {transform_indices = @transform_2, window_bounds = array<i64: 64, 256>}, {transform_indices = @transform_3, window_bounds = array<i64: 56, 256>}, {transform_indices = @transform_4, window_bounds = array<i64: 128, 128>}, {transform_indices = @transform_5, window_bounds = array<i64: 128, 128>}, {transform_indices = @transform_6, window_bounds = array<i64: 8, 128>}]} {
    %c0 = arith.constant 0 : index
    %c0_0 = arith.constant 0 : index
    %0 = vector.load %arg2[%c0, %c0_0] : memref<8x64xf32, #tpu.memory_space<vmem>>, vector<8x64xf32>
    %1 = arith.truncf %0 : vector<8x64xf32> to vector<8x64xbf16>
    %c0_1 = arith.constant 0 : index
    %c0_2 = arith.constant 0 : index
    %2 = vector.load %arg4[%c0_1, %c0_2] : memref<64x256xbf16, #tpu.memory_space<vmem>>, vector<64x256xbf16>
    %cst = arith.constant dense<0.000000e+00> : vector<8x256xf32>
    %3 = tpu.matmul %1, %2, %cst {dimension_numbers = #tpu.dot_dimension_numbers<[1], [0], [0], [1], [0, 0, 1, 1], [], []>} : vector<8x64xbf16>, vector<64x256xbf16>, vector<8x256xf32> -> vector<8x256xf32>
    %c0_3 = arith.constant 0 : index
    %c0_4 = arith.constant 0 : index
    %4 = vector.load %arg3[%c0_3, %c0_4] : memref<8x56xf32, #tpu.memory_space<vmem>>, vector<8x56xf32>
    %c0_5 = arith.constant 0 : index
    %c0_6 = arith.constant 0 : index
    %5 = vector.load %arg5[%c0_5, %c0_6] : memref<56x256xf32, #tpu.memory_space<vmem>>, vector<56x256xf32>
    %cst_7 = arith.constant dense<0.000000e+00> : vector<8x256xf32>
    %6 = tpu.matmul %4, %5, %cst_7 {dimension_numbers = #tpu.dot_dimension_numbers<[1], [0], [0], [1], [0, 0, 1, 1], [], []>, precision = #tpu.contract_precision<fp32>} : vector<8x56xf32>, vector<56x256xf32>, vector<8x256xf32> -> vector<8x256xf32>
    %7 = vector.extract_strided_slice %3 {offsets = [0, 0], sizes = [8, 128], strides = [1, 1]} : vector<8x256xf32> to vector<8x128xf32>
    %8 = vector.extract_strided_slice %3 {offsets = [0, 128], sizes = [8, 128], strides = [1, 1]} : vector<8x256xf32> to vector<8x128xf32>
    %9 = vector.extract_strided_slice %6 {offsets = [0, 0], sizes = [8, 128], strides = [1, 1]} : vector<8x256xf32> to vector<8x128xf32>
    %cst_8 = arith.constant 1.000000e-10 : f32
    %10 = vector.broadcast %cst_8 : f32 to vector<8x128xf32>
    %11 = arith.addf %9, %10 : vector<8x128xf32>
    %12 = vector.extract_strided_slice %6 {offsets = [0, 128], sizes = [8, 128], strides = [1, 1]} : vector<8x256xf32> to vector<8x128xf32>
    %13 = arith.mulf %11, %11 : vector<8x128xf32>
    %14 = arith.mulf %12, %12 : vector<8x128xf32>
    %15 = arith.addf %13, %14 : vector<8x128xf32>
    %16 = tpu.iota {dimensions = array<i32: 1>} : vector<8x128xi32>
    %c128_i32 = arith.constant 128 : i32
    %17 = arith.muli %arg1, %c128_i32 : i32
    %18 = vector.broadcast %17 : i32 to vector<8x128xi32>
    %19 = arith.addi %16, %18 : vector<8x128xi32>
    %c33_i32 = arith.constant 33 : i32
    %20 = vector.broadcast %c33_i32 : i32 to vector<8x128xi32>
    %21 = arith.cmpi slt, %19, %20 : vector<8x128xi32>
    %cst_9 = arith.constant 1.000000e+00 : f32
    %22 = vector.broadcast %cst_9 : f32 to vector<8x128xf32>
    %23 = arith.select %21, %15, %22 : vector<8x128xi1>, vector<8x128xf32>
    %24 = tpu.reciprocal %23 {approx = true} : vector<8x128xf32> -> vector<8x128xf32>
    %25 = arith.mulf %23, %24 : vector<8x128xf32>
    %cst_10 = arith.constant 2.000000e+00 : f32
    %26 = vector.broadcast %cst_10 : f32 to vector<8x128xf32>
    %27 = arith.subf %26, %25 : vector<8x128xf32>
    %28 = arith.mulf %24, %27 : vector<8x128xf32>
    %29 = arith.mulf %7, %11 : vector<8x128xf32>
    %30 = arith.mulf %8, %12 : vector<8x128xf32>
    %31 = arith.addf %29, %30 : vector<8x128xf32>
    %32 = arith.mulf %31, %28 : vector<8x128xf32>
    %33 = arith.mulf %8, %11 : vector<8x128xf32>
    %34 = arith.mulf %7, %12 : vector<8x128xf32>
    %35 = arith.subf %33, %34 : vector<8x128xf32>
    %36 = arith.mulf %35, %28 : vector<8x128xf32>
    %37 = arith.truncf %32 : vector<8x128xf32> to vector<8x128xbf16>
    %c0_11 = arith.constant 0 : index
    %c0_12 = arith.constant 0 : index
    %38 = vector.load %arg6[%c0_11, %c0_12] : memref<128x128xbf16, #tpu.memory_space<vmem>>, vector<128x128xbf16>
    %cst_13 = arith.constant dense<0.000000e+00> : vector<8x128xf32>
    %39 = tpu.matmul %37, %38, %cst_13 {dimension_numbers = #tpu.dot_dimension_numbers<[1], [0], [0], [1], [0, 0, 1, 1], [], []>} : vector<8x128xbf16>, vector<128x128xbf16>, vector<8x128xf32> -> vector<8x128xf32>
    %40 = arith.truncf %36 : vector<8x128xf32> to vector<8x128xbf16>
    %c0_14 = arith.constant 0 : index
    %c0_15 = arith.constant 0 : index
    %41 = vector.load %arg7[%c0_14, %c0_15] : memref<128x128xbf16, #tpu.memory_space<vmem>>, vector<128x128xbf16>
    %cst_16 = arith.constant dense<0.000000e+00> : vector<8x128xf32>
    %42 = tpu.matmul %40, %41, %cst_16 {dimension_numbers = #tpu.dot_dimension_numbers<[1], [0], [0], [1], [0, 0, 1, 1], [], []>} : vector<8x128xbf16>, vector<128x128xbf16>, vector<8x128xf32> -> vector<8x128xf32>
    %43 = arith.addf %39, %42 : vector<8x128xf32>
    %c0_i32 = arith.constant 0 : i32
    %44 = arith.cmpi eq, %arg1, %c0_i32 : i32
    %45 = arith.extui %44 : i1 to i32
    %c0_i32_17 = arith.constant 0 : i32
    %46 = arith.cmpi ne, %45, %c0_i32_17 : i32
    scf.if %46 {
      %c0_20 = arith.constant 0 : index
      %c0_21 = arith.constant 0 : index
      %50 = vector.load %arg8[%c0_20, %c0_21] : memref<8x128xf32, #tpu.memory_space<vmem>>, vector<8x128xf32>
      tpu.vector_store %arg8[%c0_20, %c0_21], %43 {strides = array<i32>} : memref<8x128xf32, #tpu.memory_space<vmem>>, vector<8x128xf32>,
    } else {
    }
    %c0_i32_18 = arith.constant 0 : i32
    %47 = arith.cmpi sgt, %arg1, %c0_i32_18 : i32
    %48 = arith.extui %47 : i1 to i32
    %c0_i32_19 = arith.constant 0 : i32
    %49 = arith.cmpi ne, %48, %c0_i32_19 : i32
    scf.if %49 {
      %c0_20 = arith.constant 0 : index
      %c0_21 = arith.constant 0 : index
      %50 = vector.load %arg8[%c0_20, %c0_21] : memref<8x128xf32, #tpu.memory_space<vmem>>, vector<8x128xf32>
      %51 = arith.addf %50, %43 : vector<8x128xf32>
      %c0_22 = arith.constant 0 : index
      %c0_23 = arith.constant 0 : index
      %52 = vector.load %arg8[%c0_22, %c0_23] : memref<8x128xf32, #tpu.memory_space<vmem>>, vector<8x128xf32>
      tpu.vector_store %arg8[%c0_22, %c0_23], %51 {strides = array<i32>} : memref<8x128xf32, #tpu.memory_space<vmem>>, vector<8x128xf32>,
    } else {
    }
    return
  }
  func.func @transform_0(%arg0: i32, %arg1: i32) -> (i32, i32) {
    %c0_i32 = arith.constant 0 : i32
    %c0_i32_0 = arith.constant 0 : i32
    return %arg0, %c0_i32 : i32, i32
  }
  func.func @transform_1(%arg0: i32, %arg1: i32) -> (i32, i32) {
    %c0_i32 = arith.constant 0 : i32
    %c0_i32_0 = arith.constant 0 : i32
    return %arg0, %c0_i32 : i32, i32
  }
  func.func @transform_2(%arg0: i32, %arg1: i32) -> (i32, i32) {
    %c0_i32 = arith.constant 0 : i32
    %c0_i32_0 = arith.constant 0 : i32
    return %c0_i32, %arg1 : i32, i32
  }
  func.func @transform_3(%arg0: i32, %arg1: i32) -> (i32, i32) {
    %c0_i32 = arith.constant 0 : i32
    %c0_i32_0 = arith.constant 0 : i32
    return %c0_i32, %arg1 : i32, i32
  }
  func.func @transform_4(%arg0: i32, %arg1: i32) -> (i32, i32) {
    %c0_i32 = arith.constant 0 : i32
    %c0_i32_0 = arith.constant 0 : i32
    return %arg1, %c0_i32 : i32, i32
  }
  func.func @transform_5(%arg0: i32, %arg1: i32) -> (i32, i32) {
    %c0_i32 = arith.constant 0 : i32
    %c0_i32_0 = arith.constant 0 : i32
    return %arg1, %c0_i32 : i32, i32
  }
  func.func @transform_6(%arg0: i32, %arg1: i32) -> (i32, i32) {
    %c0_i32 = arith.constant 0 : i32
    %c0_i32_0 = arith.constant 0 : i32
    return %arg0, %c0_i32 : i32, i32
  }
}

module attributes {stable_mosaic.version = 11 : i64} {
  func.func @_rir_kernel(%arg0: i32, %arg1: i32, %arg2: memref<8x64xf32, #tpu.memory_space<vmem>>, %arg3: memref<8x56xf32, #tpu.memory_space<vmem>>, %arg4: memref<64x256xbf16, #tpu.memory_space<vmem>>, %arg5: memref<56x256xf32, #tpu.memory_space<vmem>>, %arg6: memref<128x128xbf16, #tpu.memory_space<vmem>>, %arg7: memref<128x128xbf16, #tpu.memory_space<vmem>>, %arg8: memref<8x128xf32, #tpu.memory_space<vmem>>) attributes {dimension_semantics = [#tpu.dimension_semantics<parallel>, #tpu.dimension_semantics<arbitrary>], iteration_bounds = array<i64: 1, 1>, scalar_prefetch = 0 : i64, scratch_operands = 0 : i64, tpu.core_type = #tpu.core_type<tc>, window_params = [{transform_indices = @transform_0, window_bounds = array<i64: 8, 64>}, {transform_indices = @transform_1, window_bounds = array<i64: 8, 56>}, {transform_indices = @transform_2, window_bounds = array<i64: 64, 256>}, {transform_indices = @transform_3, window_bounds = array<i64: 56, 256>}, {transform_indices = @transform_4, window_bounds = array<i64: 128, 128>}, {transform_indices = @transform_5, window_bounds = array<i64: 128, 128>}, {transform_indices = @transform_6, window_bounds = array<i64: 8, 128>}]} {
    %c0 = arith.constant 0 : index
    %c0_0 = arith.constant 0 : index
    %0 = vector.load %arg2[%c0, %c0_0] : memref<8x64xf32, #tpu.memory_space<vmem>>, vector<8x64xf32>
    %1 = arith.truncf %0 : vector<8x64xf32> to vector<8x64xbf16>
    %c0_1 = arith.constant 0 : index
    %c0_2 = arith.constant 0 : index
    %2 = vector.load %arg4[%c0_1, %c0_2] : memref<64x256xbf16, #tpu.memory_space<vmem>>, vector<64x256xbf16>
    %cst = arith.constant dense<0.000000e+00> : vector<8x256xf32>
    %3 = tpu.matmul %1, %2, %cst {dimension_numbers = #tpu.dot_dimension_numbers<[1], [0], [0], [1], [0, 0, 1, 1], [], []>} : vector<8x64xbf16>, vector<64x256xbf16>, vector<8x256xf32> -> vector<8x256xf32>
    %c0_3 = arith.constant 0 : index
    %c0_4 = arith.constant 0 : index
    %4 = vector.load %arg3[%c0_3, %c0_4] : memref<8x56xf32, #tpu.memory_space<vmem>>, vector<8x56xf32>
    %c0_5 = arith.constant 0 : index
    %c0_6 = arith.constant 0 : index
    %5 = vector.load %arg5[%c0_5, %c0_6] : memref<56x256xf32, #tpu.memory_space<vmem>>, vector<56x256xf32>
    %cst_7 = arith.constant dense<0.000000e+00> : vector<8x256xf32>
    %6 = tpu.matmul %4, %5, %cst_7 {dimension_numbers = #tpu.dot_dimension_numbers<[1], [0], [0], [1], [0, 0, 1, 1], [], []>} : vector<8x56xf32>, vector<56x256xf32>, vector<8x256xf32> -> vector<8x256xf32>
    %7 = vector.extract_strided_slice %3 {offsets = [0, 0], sizes = [8, 128], strides = [1, 1]} : vector<8x256xf32> to vector<8x128xf32>
    %8 = vector.extract_strided_slice %3 {offsets = [0, 128], sizes = [8, 128], strides = [1, 1]} : vector<8x256xf32> to vector<8x128xf32>
    %9 = vector.extract_strided_slice %6 {offsets = [0, 0], sizes = [8, 128], strides = [1, 1]} : vector<8x256xf32> to vector<8x128xf32>
    %cst_8 = arith.constant 1.000000e-10 : f32
    %10 = vector.broadcast %cst_8 : f32 to vector<8x128xf32>
    %11 = arith.addf %9, %10 : vector<8x128xf32>
    %12 = vector.extract_strided_slice %6 {offsets = [0, 128], sizes = [8, 128], strides = [1, 1]} : vector<8x256xf32> to vector<8x128xf32>
    %13 = arith.mulf %11, %11 : vector<8x128xf32>
    %14 = arith.mulf %12, %12 : vector<8x128xf32>
    %15 = arith.addf %13, %14 : vector<8x128xf32>
    %16 = tpu.iota {dimensions = array<i32: 1>} : vector<8x128xi32>
    %c128_i32 = arith.constant 128 : i32
    %17 = arith.muli %arg1, %c128_i32 : i32
    %18 = vector.broadcast %17 : i32 to vector<8x128xi32>
    %19 = arith.addi %16, %18 : vector<8x128xi32>
    %c33_i32 = arith.constant 33 : i32
    %20 = vector.broadcast %c33_i32 : i32 to vector<8x128xi32>
    %21 = arith.cmpi slt, %19, %20 : vector<8x128xi32>
    %cst_9 = arith.constant 1.000000e+00 : f32
    %22 = vector.broadcast %cst_9 : f32 to vector<8x128xf32>
    %23 = arith.select %21, %15, %22 : vector<8x128xi1>, vector<8x128xf32>
    %24 = tpu.reciprocal %23 {approx = true} : vector<8x128xf32> -> vector<8x128xf32>
    %25 = arith.mulf %23, %24 : vector<8x128xf32>
    %cst_10 = arith.constant 2.000000e+00 : f32
    %26 = vector.broadcast %cst_10 : f32 to vector<8x128xf32>
    %27 = arith.subf %26, %25 : vector<8x128xf32>
    %28 = arith.mulf %24, %27 : vector<8x128xf32>
    %29 = arith.mulf %7, %11 : vector<8x128xf32>
    %30 = arith.mulf %8, %12 : vector<8x128xf32>
    %31 = arith.addf %29, %30 : vector<8x128xf32>
    %32 = arith.mulf %31, %28 : vector<8x128xf32>
    %33 = arith.mulf %8, %11 : vector<8x128xf32>
    %34 = arith.mulf %7, %12 : vector<8x128xf32>
    %35 = arith.subf %33, %34 : vector<8x128xf32>
    %36 = arith.mulf %35, %28 : vector<8x128xf32>
    %37 = arith.truncf %32 : vector<8x128xf32> to vector<8x128xbf16>
    %c0_11 = arith.constant 0 : index
    %c0_12 = arith.constant 0 : index
    %38 = vector.load %arg6[%c0_11, %c0_12] : memref<128x128xbf16, #tpu.memory_space<vmem>>, vector<128x128xbf16>
    %cst_13 = arith.constant dense<0.000000e+00> : vector<8x128xf32>
    %39 = tpu.matmul %37, %38, %cst_13 {dimension_numbers = #tpu.dot_dimension_numbers<[1], [0], [0], [1], [0, 0, 1, 1], [], []>} : vector<8x128xbf16>, vector<128x128xbf16>, vector<8x128xf32> -> vector<8x128xf32>
    %40 = arith.truncf %36 : vector<8x128xf32> to vector<8x128xbf16>
    %c0_14 = arith.constant 0 : index
    %c0_15 = arith.constant 0 : index
    %41 = vector.load %arg7[%c0_14, %c0_15] : memref<128x128xbf16, #tpu.memory_space<vmem>>, vector<128x128xbf16>
    %cst_16 = arith.constant dense<0.000000e+00> : vector<8x128xf32>
    %42 = tpu.matmul %40, %41, %cst_16 {dimension_numbers = #tpu.dot_dimension_numbers<[1], [0], [0], [1], [0, 0, 1, 1], [], []>} : vector<8x128xbf16>, vector<128x128xbf16>, vector<8x128xf32> -> vector<8x128xf32>
    %43 = arith.addf %39, %42 : vector<8x128xf32>
    %c0_i32 = arith.constant 0 : i32
    %44 = arith.cmpi eq, %arg1, %c0_i32 : i32
    %45 = arith.extui %44 : i1 to i32
    %c0_i32_17 = arith.constant 0 : i32
    %46 = arith.cmpi ne, %45, %c0_i32_17 : i32
    scf.if %46 {
      %c0_20 = arith.constant 0 : index
      %c0_21 = arith.constant 0 : index
      %50 = vector.load %arg8[%c0_20, %c0_21] : memref<8x128xf32, #tpu.memory_space<vmem>>, vector<8x128xf32>
      tpu.vector_store %arg8[%c0_20, %c0_21], %43 {strides = array<i32>} : memref<8x128xf32, #tpu.memory_space<vmem>>, vector<8x128xf32>,
    } else {
    }
    %c0_i32_18 = arith.constant 0 : i32
    %47 = arith.cmpi sgt, %arg1, %c0_i32_18 : i32
    %48 = arith.extui %47 : i1 to i32
    %c0_i32_19 = arith.constant 0 : i32
    %49 = arith.cmpi ne, %48, %c0_i32_19 : i32
    scf.if %49 {
      %c0_20 = arith.constant 0 : index
      %c0_21 = arith.constant 0 : index
      %50 = vector.load %arg8[%c0_20, %c0_21] : memref<8x128xf32, #tpu.memory_space<vmem>>, vector<8x128xf32>
      %51 = arith.addf %50, %43 : vector<8x128xf32>
      %c0_22 = arith.constant 0 : index
      %c0_23 = arith.constant 0 : index
      %52 = vector.load %arg8[%c0_22, %c0_23] : memref<8x128xf32, #tpu.memory_space<vmem>>, vector<8x128xf32>
      tpu.vector_store %arg8[%c0_22, %c0_23], %51 {strides = array<i32>} : memref<8x128xf32, #tpu.memory_space<vmem>>, vector<8x128xf32>,
    } else {
    }
    return
  }
  func.func @transform_0(%arg0: i32, %arg1: i32) -> (i32, i32) {
    %c0_i32 = arith.constant 0 : i32
    %c0_i32_0 = arith.constant 0 : i32
    return %arg0, %c0_i32 : i32, i32
  }
  func.func @transform_1(%arg0: i32, %arg1: i32) -> (i32, i32) {
    %c0_i32 = arith.constant 0 : i32
    %c0_i32_0 = arith.constant 0 : i32
    return %arg0, %c0_i32 : i32, i32
  }
  func.func @transform_2(%arg0: i32, %arg1: i32) -> (i32, i32) {
    %c0_i32 = arith.constant 0 : i32
    %c0_i32_0 = arith.constant 0 : i32
    return %c0_i32, %arg1 : i32, i32
  }
  func.func @transform_3(%arg0: i32, %arg1: i32) -> (i32, i32) {
    %c0_i32 = arith.constant 0 : i32
    %c0_i32_0 = arith.constant 0 : i32
    return %c0_i32, %arg1 : i32, i32
  }
  func.func @transform_4(%arg0: i32, %arg1: i32) -> (i32, i32) {
    %c0_i32 = arith.constant 0 : i32
    %c0_i32_0 = arith.constant 0 : i32
    return %arg1, %c0_i32 : i32, i32
  }
  func.func @transform_5(%arg0: i32, %arg1: i32) -> (i32, i32) {
    %c0_i32 = arith.constant 0 : i32
    %c0_i32_0 = arith.constant 0 : i32
    return %arg1, %c0_i32 : i32, i32
  }
  func.func @transform_6(%arg0: i32, %arg1: i32) -> (i32, i32) {
    %c0_i32 = arith.constant 0 : i32
    %c0_i32_0 = arith.constant 0 : i32
    return %arg0, %c0_i32 : i32, i32
  }
}

</mosaic_0001>

<bundles_post_ra>
// kernel: _forward.1
= control target key start
LH: loop header
LB: loop body
LE: loop exit
PB: predicated region body
PF: predicated region fallthrough
CT: control target
= control target key end

     0   :  { %11 = vsyncpa [#allocation3], 0  ;;  %s1380_s0 = inlined_call_operand.vmem [shape: f32[8,64], index: 0, kind: input, shape index: {}]   ;;  %s1381_s1 = inlined_call_operand.vmem [shape: f32[8,56], index: 1, kind: input, shape index: {}]   ;;  %s1382_s2 = inlined_call_operand.hbm [shape: bf16[64,256], index: 2, kind: input, shape index: {}]   ;;  %s1383_s3 = inlined_call_operand.hbm [shape: f32[56,256], index: 3, kind: input, shape index: {}]   ;;  %s1384_s4 = inlined_call_operand.hbm [shape: bf16[128,128], index: 4, kind: input, shape index: {}]   ;;  %s1385_s5 = inlined_call_operand.hbm [shape: bf16[128,128], index: 5, kind: input, shape index: {}]   ;;  %s1386_s6 = inlined_call_operand.hbm [shape: f32[8,128], index: 6, kind: output, shape index: {}]  }
   0x1   :  { %12 = vsyncpa [#allocation6], 0 }
   0x2   :  { %13 = vsyncpa [#allocation9], 0  ;;  %s36_s23 = sshll.u32 %s1383_s3, 4  ;;  %s37_s23 = int_to_ptr.hbm [resolvable:$true] %s36_s23 }
   0x3   :  { %14 = vsyncpa [#allocation4], 0  ;;  %s1108_s24 = smov [#allocation5]   ;;  %s23_s28 = sshll.u32 %s1382_s2, 4  ;;  %s24_s28 = int_to_ptr.hbm [resolvable:$true] %s23_s28 }
   0x4   :  { %s38_s25 = sshll.u32 %s1108_s24, 4  ;;  %s1109_s29 = smov 256   ;;  %s39_s25 = int_to_ptr.vmem [resolvable:$true] %s38_s25 }
   0x5   :  { %s1110_s30 = smov 16   ;;  %s1111_s7 = smov [#allocation2]  }
   0x6   :  { %44 = dma.hbm_to_vmem [thread:$0]  %s37_s23, 1792, %s39_s25, [#allocation6], %s1109_s29, %s1109_s29, %s1110_s30  }
   0x7   :  { %s25_s8 = sshll.u32 %s1111_s7, 4  ;;  %s1112_s9 = smov 128   ;;  %s26_s8 = int_to_ptr.vmem [resolvable:$true] %s25_s8 }
   0x8   :  { %s1113_s10 = smov 8   ;;  %s49_s12 = sshll.u32 %s1384_s4, 4  ;;  %s50_s12 = int_to_ptr.hbm [resolvable:$true] %s49_s12 }
   0x9   :  { %31 = dma.hbm_to_vmem [thread:$0]  %s24_s28, 1024, %s26_s8, [#allocation3], %s1112_s9, %s1112_s9, %s1113_s10  }
   0xa   :  { %s1114_s13 = smov [#allocation7]   ;;  %s62_s16 = sshll.u32 %s1385_s5, 4  ;;  %s63_s16 = int_to_ptr.hbm [resolvable:$true] %s62_s16 }
   0xb   :  { %s51_s14 = sshll.u32 %s1114_s13, 4  ;;  %s1115_s17 = smov 64   ;;  %s52_s14 = int_to_ptr.vmem [resolvable:$true] %s51_s14 }
   0xc   :  { %s1116_s18 = smov 4   ;;  %s1117_s19 = smov [#allocation8]  }
   0xd   :  { %57 = dma.hbm_to_vmem [thread:$0]  %s50_s12, 1024, %s52_s14, [#allocation6], %s1115_s17, %s1115_s17, %s1116_s18  }
   0xe   :  { %s64_s20 = sshll.u32 %s1117_s19, 4  ;;  %s65_s20 = int_to_ptr.vmem [resolvable:$true] %s64_s20 }
   0xf   :  { %70 = dma.hbm_to_vmem [thread:$0]  %s63_s16, 1024, %s65_s20, [#allocation9], %s1115_s17, %s1115_s17, %s1116_s18  }
  0x10   :  { %1100 = dma.done.wait [#allocation3], 1024  }
  0x11   :  { %1101 = vsyncadd [#allocation3], 4294966272 }
  0x12   :  { %1102 = dma.done.wait [#allocation6], 2816  }
  0x13   :  { %1103 = vsyncadd [#allocation6], 4294964480 }
  0x14   :  { %1104 = dma.done.wait [#allocation9], 1024  }
  0x15   :  { %1105 = vsyncadd [#allocation9], 4294966272  ;;  %v181_v0 = vld [vmem:[#allocation5 + $0x60] sm:$0xff]  ;;  %v179_v1 = vld [vmem:[#allocation5 + $0x50] sm:$0xff]  ;;  %vm183_vm0 = vcmask 457728   ;;  %vm138_vm1 = vcmask 523264  }
  0x16   :  { %v177_v2 = vld [vmem:[#allocation5 + $0x40] sm:$0xff]  ;;  %v1166_v3 = vand.u32 4294901760, %v181_v0  ;;  %v1168_v4 = vand.u32 4294901760, %v179_v1  ;;  %v175_v6 = vld [vmem:[#allocation5 + $0x30] sm:$0xff]  ;;  %v950_v34 = vld [vmem:[#allocation2 + $0x34] sm:$0xf0] }
  0x17   :  { %v1170_v5 = vand.u32 4294901760, %v177_v2  ;;  %v173_v7 = vld [vmem:[#allocation5 + $0x20] sm:$0xff]  ;;  %v171_v8 = vld [vmem:[#allocation5 + $0x10] sm:$0xff]  ;;  %v1172_v9 = vand.u32 4294901760, %v175_v6  ;;  %v873_v36 = vld [vmem:[#allocation2 + $0x38] sm:$0xf0] }
  0x18   :  { %v1174_v10 = vand.u32 4294901760, %v173_v7  ;;  %v1176_v11 = vand.u32 4294901760, %v171_v8  ;;  %v169_v12 = vld [vmem:[#allocation5] sm:$0xff]  ;;  %197 = vmatpush.msra.mxu2 %v1166_v3  ;;  %v1183_v14 = vsub.f32 %v181_v0, %v1166_v3  ;;  %v1186_v15 = vsub.f32 %v179_v1, %v1168_v4  ;;  %v871_v32 = vld [vmem:[#allocation2 + $0x30] sm:$0xf]  ;;  %s833_s25 = sshll.u32 %s1386_s6, 4  ;;  %s834_s25 = int_to_ptr.hbm [resolvable:$true] %s833_s25 }
  0x19   :  { %v168_v13 = vld [vmem:[%s1381_s1] sm:$0xff]  ;;  %v1188_v16 = vand.u32 4294901760, %v169_v12  ;;  %v1191_v17 = vsub.f32 %v177_v2, %v1170_v5  ;;  %v1194_v18 = vsub.f32 %v175_v6, %v1172_v9  ;;  %v949_v35 = vld [vmem:[#allocation2 + $0x34] sm:$0xf]  ;;  %v872_v45 = vor.u32 %v950_v34, %v871_v32  ;;  %v948_v48 = vld [vmem:[#allocation2 + $0x24] sm:$0xf0] }
  0x1a   :  { %v1197_v19 = vsub.f32 %v173_v7, %v1174_v10  ;;  %v185_v20 = vsel %vm183_vm0, %v168_v13, 0  ;;  %199 = vmatpush.msra.mxu2 %v1168_v4  ;;  %v230_v21 = vand.u32 4294901760, %v1183_v14  ;;  %v236_v22 = vand.u32 4294901760, %v1186_v15  ;;  %v863_v47 = vld [vmem:[#allocation2 + $0x20] sm:$0xf]  ;;  %v182_v2 = vld [vmem:[#allocation5 + $0x68] sm:$0xff] }
  0x1b   :  { %v242_v23 = vand.u32 4294901760, %v1191_v17  ;;  %v1205_v24 = vsub.f32 %v171_v8, %v1176_v11  ;;  %v248_v25 = vand.u32 4294901760, %v1194_v18  ;;  %v1209_v26 = vsub.f32 %v169_v12, %v1188_v16  ;;  %v947_v50 = vld [vmem:[#allocation2 + $0x24] sm:$0xf]  ;;  %v865_v51 = vld [vmem:[#allocation2 + $0x28] sm:$0xf0]  ;;  %146 = vmatpush.bf16.msra.mxu0 %v872_v45 }
  0x1c   :  { %v1211_v27 = vand.u32 4294901760, %v185_v20  ;;  %201 = vmatpush.msra.mxu2 %v1170_v5  ;;  %v231_v28 = vsub.f32 %v1183_v14, %v230_v21  ;;  %v237_v29 = vsub.f32 %v1186_v15, %v236_v22  ;;  %v254_v31 = vand.u32 4294901760, %v1197_v19  ;;  %v855_v59 = vld [vmem:[#allocation2 + $0x10] sm:$0xf]  ;;  %v946_v60 = vld [vmem:[#allocation2 + $0x14] sm:$0xf0] }
  0x1d   :  { %v243_v30 = vsub.f32 %v1191_v17, %v242_v23  ;;  %v249_v39 = vsub.f32 %v1194_v18, %v248_v25  ;;  %v260_v40 = vand.u32 4294901760, %v1205_v24  ;;  %v266_v41 = vand.u32 4294901760, %v1209_v26  ;;  %v945_v61 = vld [vmem:[#allocation2 + $0x14] sm:$0xf]  ;;  %v857_v62 = vld [vmem:[#allocation2 + $0x18] sm:$0xf0] }
  0x1e   :  { %v1225_v33 = vsub.f32 %v185_v20, %v1211_v27  ;;  %203 = vmatpush.msra.mxu2 %v1172_v9  ;;  %v232_v37 = vand.u32 4294901760, %v231_v28  ;;  %v238_v38 = vand.u32 4294901760, %v237_v29  ;;  %v255_v44 = vsub.f32 %v1197_v19, %v254_v31  ;;  %v847_v7 = vld [vmem:[#allocation2] sm:$0xf]  ;;  %v944_v8 = vld [vmem:[#allocation2 + $0x4] sm:$0xf0] }
  0x1f   :  { %v244_v43 = vand.u32 4294901760, %v243_v30  ;;  %v876_v46 = vor.u32 %v949_v35, %v873_v36  ;;  %v250_v52 = vand.u32 4294901760, %v249_v39  ;;  %v261_v53 = vsub.f32 %v1205_v24, %v260_v40  ;;  %v943_v12 = vld [vmem:[#allocation2 + $0x4] sm:$0xf]  ;;  %v849_v13 = vld [vmem:[#allocation2 + $0x8] sm:$0xf0] }
  0x20   :  { %v1234_v42 = vand.u32 4294901760, %v1225_v33  ;;  %205 = vmatpush.msra.mxu2 %v1174_v10  ;;  %233 = vmatpush.msra.mxu3 %v232_v37  ;;  %v864_v55 = vor.u32 %v948_v48, %v863_v47  ;;  %v256_v56 = vand.u32 4294901760, %v255_v44  ;;  %v267_v57 = vsub.f32 %v1209_v26, %v266_v41  ;;  %v88_v30 = vld [vmem:[%s1380_s0] sm:$0xff]  ;;  %v180_v32 = vld [vmem:[#allocation5 + $0x58] sm:$0xff]  ;;  %v178_v35 = vld [vmem:[#allocation5 + $0x48] sm:$0xff]  ;;  %s1118_s0 = smov [#allocation10]  }
  0x21   :  { %159 = vmatpush.bf16.msra.mxu1 %v876_v46  ;;  %v868_v58 = vor.u32 %v947_v50, %v865_v51  ;;  %v262_v63 = vand.u32 4294901760, %v261_v53  ;;  %v856_v0 = vor.u32 %v946_v60, %v855_v59  ;;  %v860_v6 = vor.u32 %v945_v61, %v857_v62  ;;  %v966_v59 = vld [vmem:[#allocation8 + $0x38] sm:$0xff]  ;;  %v965_v62 = vld [vmem:[#allocation8 + $0x30] sm:$0xff]  ;;  %s831_s22 = sshll.u32 %s1118_s0, 4  ;;  %s832_s22 = int_to_ptr.vmem [resolvable:$true] %s831_s22 }
  0x22   :  { %v213_v49 = vsub.f32 %v1225_v33, %v1234_v42  ;;  %207 = vmatpush.msra.mxu2 %v1176_v11  ;;  %239 = vmatpush.msra.mxu3 %v238_v38  ;;  %v268_v1 = vand.u32 4294901760, %v267_v57  ;;  %v1257_v20 = vand.u32 4294901760, %v182_v2  ;;  %v848_v28 = vor.u32 %v944_v8, %v847_v7  ;;  %v176_v38 = vld [vmem:[#allocation5 + $0x38] sm:$0xff]  ;;  %v958_v60 = vld [vmem:[#allocation7 + $0x38] sm:$0xff]  ;;  %v955_v7 = vld [vmem:[#allocation7 + $0x20] sm:$0xff] }
  0x23   :  { %147 = vmatpush.bf16.msra.mxu0 %v864_v55  ;;  %v852_v29 = vor.u32 %v943_v12, %v849_v13  ;;  %v89_v36 = vpack.c.bf16 %v88_v30, %v88_v30  ;;  %v1272_v37 = vand.u32 4294901760, %v180_v32  ;;  %v1279_v39 = vand.u32 4294901760, %v178_v35  ;;  %v962_v8 = vld [vmem:[#allocation8 + $0x18] sm:$0xff]  ;;  %v953_v30 = vld [vmem:[#allocation7 + $0x10] sm:$0xff] }
  0x24   :  { %v1246_v54 = vand.u32 4294901760, %v213_v49  ;;  %209 = vmatpush.msra.mxu2 %v1188_v16  ;;  %245 = vmatpush.msra.mxu3 %v244_v43  ;;  %v1268_v34 = vsub.f32 %v182_v2, %v1257_v20  ;;  %v174_v43 = vld [vmem:[#allocation5 + $0x28] sm:$0xff]  ;;  %v1284_v44 = vand.u32 4294901760, %v176_v38  ;;  %v956_v2 = vld [vmem:[#allocation7 + $0x28] sm:$0xff] }
  0x25   :  { %160 = vmatpush.bf16.msra.mxu1 %v868_v58  ;;  %v954_v12 = vld [vmem:[#allocation7 + $0x18] sm:$0xff] }
  0x26   :  { %286 = vmatpush.msrb.mxu2 %v1183_v14  ;;  %251 = vmatpush.msra.mxu3 %v250_v52  ;;  %v1287_v14 = vsub.f32 %v180_v32, %v1272_v37 }
  0x27   :  { %215 = vmatmul.f32.vlgmr.msra.gmra.mxu2 %v1246_v54  ;;  %148 = vmatpush.bf16.msra.mxu0 %v856_v0 }
  0x28   :  { %289 = vmatpush.msrb.mxu2 %v1186_v15  ;;  %257 = vmatpush.msra.mxu3 %v256_v56  ;;  %v1296_v15 = vsub.f32 %v178_v35, %v1279_v39  ;;  %v952_v35 = vld [vmem:[#allocation7 + $0x8] sm:$0xff] }
  0x29   :  { %161 = vmatpush.bf16.msra.mxu1 %v860_v6  ;;  %v963_v6 = vld [vmem:[#allocation8 + $0x20] sm:$0xff] }
  0x2a   :  { %292 = vmatpush.msrb.mxu2 %v1191_v17  ;;  %263 = vmatpush.msra.mxu3 %v262_v63  ;;  %v1304_v17 = vsub.f32 %v176_v38, %v1284_v44  ;;  %v957_v63 = vld [vmem:[#allocation7 + $0x30] sm:$0xff]  ;;  %v951_v38 = vld [vmem:[#allocation7] sm:$0xff] }
  0x2b   :  { %149 = vmatpush.bf16.msra.mxu0 %v848_v28 }
  0x2c   :  { %295 = vmatpush.msrb.mxu2 %v1194_v18  ;;  %269 = vmatpush.msra.mxu3 %v268_v1  ;;  %v964_v1 = vld [vmem:[#allocation8 + $0x28] sm:$0xff] }
  0x2d   :  { %271 = vmatmul.f32.vlgmr.msra.gmra.mxu3 %v1211_v27  ;;  %162 = vmatpush.bf16.msra.mxu1 %v852_v29  ;;  %v961_v29 = vld [vmem:[#allocation8 + $0x10] sm:$0xff] }
  0x2e   :  { %298 = vmatpush.msrb.mxu2 %v1197_v19  ;;  %321 = vmatpush.msrb.mxu3 %v1166_v3  ;;  %v454_v19 = vand.u32 4294901760, %v1268_v34 }
  0x2f   :  { %510 = vmatpush.msrb.mxu0 %v1268_v34 }
  0x30   :  { %301 = vmatpush.msrb.mxu2 %v1205_v24  ;;  %323 = vmatpush.msrb.mxu3 %v1168_v4 }
  0x31   :  { %877 = vmatmul.msk.bf16.vlgmr.msra.gmra.mxu0 %vm138_vm1, %v89_v36  ;;  %878 = vmatmul.msk.bf16.vlgmr.msra.gmra.mxu1 %vm138_vm1, %v89_v36 }
  0x32   :  { %304 = vmatpush.msrb.mxu2 %v1209_v26  ;;  %325 = vmatpush.msrb.mxu3 %v1170_v5 }
  0x33   :  { %307 = vmatmul.f32.vlgmr.msrb.gmra.mxu2 %v1225_v33  ;;  %545 = vmatpush.msrb.mxu1 %v1257_v20 }
  0x34   :  { %353 = vmatpush.msra.mxu2 %v230_v21  ;;  %327 = vmatpush.msrb.mxu3 %v1172_v9  ;;  %v1293_v21 = vand.u32 4294901760, %v174_v43 }
  0x35   :  { %513 = vmatpush.msrb.mxu0 %v1287_v14  ;;  %547 = vmatpush.msrb.mxu1 %v1272_v37 }
  0x36   :  { %357 = vmatpush.msra.mxu2 %v236_v22  ;;  %329 = vmatpush.msrb.mxu3 %v1174_v10  ;;  %v172_v22 = vld [vmem:[#allocation5 + $0x18] sm:$0xff] }
  0x37   :  { %516 = vmatpush.msrb.mxu0 %v1296_v15  ;;  %v1311_v18 = vand.u32 4294901760, %v172_v22  ;;  %549 = vmatpush.msrb.mxu1 %v1279_v39 }
  0x38   :  { %361 = vmatpush.msra.mxu2 %v242_v23  ;;  %331 = vmatpush.msrb.mxu3 %v1176_v11  ;;  %v170_v23 = vld [vmem:[#allocation5 + $0x8] sm:$0xff] }
  0x39   :  { %519 = vmatpush.msrb.mxu0 %v1304_v17  ;;  %v483_v24 = vsub.f32 %v172_v22, %v1311_v18  ;;  %551 = vmatpush.msrb.mxu1 %v1284_v44 }
  0x3a   :  { %365 = vmatpush.msra.mxu2 %v248_v25  ;;  %333 = vmatpush.msrb.mxu3 %v1188_v16  ;;  %v1314_v25 = vsub.f32 %v174_v43, %v1293_v21 }
  0x3b   :  { %337 = vmatmul.f32.vlgmr.msrb.gmra.mxu3 %v1234_v42  ;;  %553 = vmatpush.msrb.mxu1 %v1293_v21  ;;  %v484_v48 = vand.u32 4294901760, %v483_v24 }
  0x3c   :  { %369 = vmatpush.msra.mxu2 %v254_v31  ;;  %393 = vmatpush.msra.mxu3 %v1166_v3  ;;  %v1321_v31 = vand.u32 4294901760, %v170_v23  ;;  %v460_v3 = vand.u32 4294901760, %v1287_v14  ;;  %v478_v46 = vand.u32 4294901760, %v1314_v25 }
  0x3d   :  { %522 = vmatpush.msrb.mxu0 %v1314_v25  ;;  %555 = vmatpush.msrb.mxu1 %v1311_v18  ;;  %v485_v50 = vsub.f32 %v483_v24, %v484_v48 }
  0x3e   :  { %373 = vmatpush.msra.mxu2 %v260_v40  ;;  %395 = vmatpush.msra.mxu3 %v1168_v4  ;;  %v455_v4 = vsub.f32 %v1268_v34, %v454_v19  ;;  %v466_v40 = vand.u32 4294901760, %v1296_v15  ;;  %v489_v26 = vsub.f32 %v170_v23, %v1321_v31  ;;  %v960_v34 = vld [vmem:[#allocation8 + $0x8] sm:$0xff] }
  0x3f   :  { %525 = vmatpush.msrb.mxu0 %v483_v24  ;;  %557 = vmatpush.msrb.mxu1 %v1321_v31 }
  0x40   :  { %377 = vmatpush.msra.mxu2 %v266_v41  ;;  %397 = vmatpush.msra.mxu3 %v1170_v5  ;;  %v461_v5 = vsub.f32 %v1287_v14, %v460_v3  ;;  %v472_v41 = vand.u32 4294901760, %v1304_v17  ;;  %v467_v45 = vsub.f32 %v1296_v15, %v466_v40  ;;  %v490_v49 = vand.u32 4294901760, %v489_v26 }
  0x41   :  { %379 = vmatmul.f32.vlgmr.msra.gmra.mxu2 %v1211_v27  ;;  %528 = vmatpush.msrb.mxu0 %v489_v26 }
  0x42   :  { %399 = vmatpush.msra.mxu3 %v1172_v9  ;;  %421 = vmatpush.msrb.mxu2 %v1257_v20  ;;  %v456_v9 = vand.u32 4294901760, %v455_v4  ;;  %v473_v47 = vsub.f32 %v1304_v17, %v472_v41  ;;  %v491_v52 = vsub.f32 %v489_v26, %v490_v49 }
  0x43   :  { %531 = vmatmul.f32.vlgmr.msrb.gmra.mxu0 %v1225_v33  ;;  %561 = vmatmul.f32.vlgmr.msrb.gmra.mxu1 %v1234_v42  ;;  %v479_v33 = vsub.f32 %v1314_v25, %v478_v46  ;;  %v486_v42 = vand.u32 4294901760, %v485_v50  ;;  %v639_v25 = vlaneseq }
  0x44   :  { %401 = vmatpush.msra.mxu3 %v1174_v10  ;;  %423 = vmatpush.msrb.mxu2 %v1272_v37  ;;  %v462_v10 = vand.u32 4294901760, %v461_v5  ;;  %v492_v53 = vand.u32 4294901760, %v491_v52 }
  0x45   :  { %v480_v51 = vand.u32 4294901760, %v479_v33  ;;  %740 = vmatpush.bf16.msra.mxu0 %v966_v59  ;;  %801 = vmatpush.bf16.msra.mxu1 %v958_v60  ;;  %v640_v24 = vand.u32 127, %v639_v25 }
  0x46   :  { %403 = vmatpush.msra.mxu3 %v1176_v11  ;;  %425 = vmatpush.msrb.mxu2 %v1279_v39  ;;  %v468_v11 = vand.u32 4294901760, %v467_v45 }
  0x47   :  { %vm644_vm2 = vcmp.lt.s32.totalorder %v640_v24, 33 }
  0x48   :  { %405 = vmatpush.msra.mxu3 %v1188_v16  ;;  %427 = vmatpush.msrb.mxu2 %v1284_v44  ;;  %v474_v16 = vand.u32 4294901760, %v473_v47 }
  0x49   :  { %407 = vmatmul.f32.vlgmr.msra.gmra.mxu3 %v1211_v27  ;;  %741 = vmatpush.bf16.msra.mxu0 %v965_v62 }
  0x4a   :  { %457 = vmatpush.msrb.mxu3 %v456_v9  ;;  %429 = vmatpush.msrb.mxu2 %v1293_v21 }
  0x4b   :  { %802 = vmatpush.bf16.msra.mxu1 %v957_v63 }
  0x4c   :  { %463 = vmatpush.msrb.mxu3 %v462_v10  ;;  %431 = vmatpush.msrb.mxu2 %v1311_v18 }
  0x4d   :  { %742 = vmatpush.bf16.msra.mxu0 %v964_v1 }
  0x4e   :  { %469 = vmatpush.msrb.mxu3 %v468_v11  ;;  %433 = vmatpush.msrb.mxu2 %v1321_v31 }
  0x4f   :  { %439 = vmatmul.f32.vlgmr.msrb.gmra.mxu2 %v1246_v54  ;;  %803 = vmatpush.bf16.msra.mxu1 %v956_v2 }
  0x50   :  { %577 = vmatpush.msra.mxu2 %v454_v19  ;;  %475 = vmatpush.msrb.mxu3 %v474_v16 }
  0x51   :  { %743 = vmatpush.bf16.msra.mxu0 %v963_v6 }
  0x52   :  { %581 = vmatpush.msra.mxu2 %v460_v3  ;;  %481 = vmatpush.msrb.mxu3 %v480_v51 }
  0x53   :  { %804 = vmatpush.bf16.msra.mxu1 %v955_v7 }
  0x54   :  { %585 = vmatpush.msra.mxu2 %v466_v40  ;;  %487 = vmatpush.msrb.mxu3 %v486_v42 }
  0x55   :  { %744 = vmatpush.bf16.msra.mxu0 %v962_v8 }
  0x56   :  { %589 = vmatpush.msra.mxu2 %v472_v41  ;;  %493 = vmatpush.msrb.mxu3 %v492_v53 }
  0x57   :  { %495 = vmatmul.f32.vlgmr.msrb.gmra.mxu3 %v1211_v27  ;;  %805 = vmatpush.bf16.msra.mxu1 %v954_v12 }
  0x58   :  { %617 = vmatpush.msra.mxu3 %v1257_v20  ;;  %593 = vmatpush.msra.mxu2 %v478_v46 }
  0x59   :  { %745 = vmatpush.bf16.msra.mxu0 %v961_v29 }
  0x5a   :  { %619 = vmatpush.msra.mxu3 %v1272_v37  ;;  %597 = vmatpush.msra.mxu2 %v484_v48  ;;  %v959_v37 = vld [vmem:[#allocation8] sm:$0xff] }
  0x5b   :  { %806 = vmatpush.bf16.msra.mxu1 %v953_v30 }
  0x5c   :  { %621 = vmatpush.msra.mxu3 %v1279_v39  ;;  %601 = vmatpush.msra.mxu2 %v490_v49 }
  0x5d   :  { %603 = vmatmul.f32.vlgmr.msra.gmra.mxu2 %v1211_v27  ;;  %746 = vmatpush.bf16.msra.mxu0 %v960_v34 }
  0x5e   :  { %623 = vmatpush.msra.mxu3 %v1284_v44 }
  0x5f   :  { %807 = vmatpush.bf16.msra.mxu1 %v952_v35 }
  0x60   :  { %625 = vmatpush.msra.mxu3 %v1293_v21 }
  0x61   :  { %747 = vmatpush.bf16.msra.mxu0 %v959_v37 }
  0x62   :  { %627 = vmatpush.msra.mxu3 %v1311_v18 }
  0x63   :  { %808 = vmatpush.bf16.msra.mxu1 %v951_v38 }
  0x64   :  { %629 = vmatpush.msra.mxu3 %v1321_v31 }
  0x65   :  { %631 = vmatmul.f32.vlgmr.msra.gmra.mxu3 %v1211_v27 }
  0xaa   :  { %v216_v58 = vpop.f32.mrf.mxu2 }
  0xae   :  { %v1369_v54 = vpop.f32.mrf.mxu0  ;;  %v1371_v55 = vpop.f32.mrf.mxu1 }
  0xb0   :  { %v272_v61 = vpop.f32.mrf.mxu3 }
  0xb1   :  { %v273_v20 = vadd.f32 %v272_v61, %v216_v58 }
  0xb6   :  { %v153_v56 = vpop.f32.mrf.mxu0  ;;  %v166_v57 = vpop.f32.mrf.mxu1 }
  0xb7   :  { %v308_v0 = vpop.f32.mrf.mxu2 }
  0xb8   :  { %v309_v32 = vadd.f32 %v308_v0, %v273_v20 }
  0xbe   :  { %v338_v27 = vpop.f32.mrf.mxu3 }
  0xbf   :  { %v339_v39 = vadd.f32 %v338_v27, %v309_v32 }
  0xc0   :  { %v532_v44 = vpop.f32.mrf.mxu0  ;;  %v562_v22 = vpop.f32.mrf.mxu1 }
  0xc4   :  { %v380_v13 = vpop.f32.mrf.mxu2 }
  0xc5   :  { %v381_v15 = vadd.f32 %v380_v13, %v339_v39 }
  0xcc   :  { %v408_v28 = vpop.f32.mrf.mxu3 }
  0xcd   :  { %v409_v17 = vadd.f32 %v408_v28, %v381_v15 }
  0xcf   :  { %v635_v19 = vadd.f32 1e-10, %v409_v17 }
  0xd1   :  { %v636_v40 = vmul.f32 %v635_v19, %v635_v19  ;;  %v650_v26 = vmul.f32 %v635_v19, %v1369_v54  ;;  %v654_v5 = vmul.f32 %v635_v19, %v1371_v55 }
  0xd2   :  { %v440_v36 = vpop.f32.mrf.mxu2 }
  0xda   :  { %v496_v43 = vpop.f32.mrf.mxu3 }
  0xdb   :  { %v497_v14 = vadd.f32 %v496_v43, %v440_v36 }
  0xdd   :  { %v533_v21 = vadd.f32 %v532_v44, %v497_v14 }
  0xdf   :  { %v563_v23 = vadd.f32 %v562_v22, %v533_v21 }
  0xe0   :  { %v604_v18 = vpop.f32.mrf.mxu2 }
  0xe1   :  { %v605_v31 = vadd.f32 %v604_v18, %v563_v23 }
  0xe8   :  { %v632_v3 = vpop.f32.mrf.mxu3 }
  0xe9   :  { %v633_v4 = vadd.f32 %v632_v3, %v605_v31 }
  0xeb   :  { %v637_v41 = vmul.f32 %v633_v4, %v633_v4  ;;  %v651_v9 = vmul.f32 %v633_v4, %v1371_v55  ;;  %v655_v45 = vmul.f32 %v633_v4, %v1369_v54 }
  0xed   :  { %v638_v46 = vadd.f32 %v637_v41, %v636_v40  ;;  %v652_v10 = vadd.f32 %v651_v9, %v650_v26  ;;  %v656_v47 = vsub.f32 %v654_v5, %v655_v45 }
  0xef   :  { %v645_v48 = vsel %vm644_vm2, %v638_v46, 1.0 }
  0xf0   :  { %978 = vrcp.f32 %v645_v48 }
  0xf6   :  { %v979_v11 = vpop.eup %978 }
  0xf7   :  { %v647_v33 = vmul.f32 %v979_v11, %v645_v48 }
  0xf9   :  { %v648_v49 = vsub.f32 2.0, %v647_v33 }
  0xfb   :  { %v649_v16 = vmul.f32 %v979_v11, %v648_v49 }
  0xfd   :  { %v657_v50 = vmul.f32 %v656_v47, %v649_v16  ;;  %v653_v51 = vmul.f32 %v652_v10, %v649_v16 }
  0xff   :  { %v675_v52 = vpack.c.bf16 %v657_v50, %v657_v50  ;;  %v658_v42 = vpack.c.bf16 %v653_v51, %v653_v51 }
 0x101   :  { %748 = vmatmul.bf16.vlgmr.msra.gmra.mxu0 %v675_v52  ;;  %809 = vmatmul.bf16.vlgmr.msra.gmra.mxu1 %v658_v42 }
 0x17e   :  { %v749_v53 = vpop.f32.mrf.mxu0  ;;  %v810_v54 = vpop.f32.mrf.mxu1 }
 0x17f   :  { %v811_v55 = vadd.f32 %v810_v54, %v749_v53 }
 0x181   :  { %818 = vst [vmem:[#allocation10] sm:$0xff] %v811_v55 }
 0x182   :  { %836 = dma.vmem_to_hbm [thread:$0]  %s832_s22, 128, %s834_s25, [#allocation4]  }
 0x186   :  { %v751_v56 = vpop.f32.mrf.mxu0  ;;  %v812_v57 = vpop.f32.mrf.mxu1 }
 0x187   :  { %1106 = dma.done.wait [#allocation4], 128  }
 0x188   :  { %1107 = vsyncadd [#allocation4], 4294967168 }
 0x189   :  { %841 = vsyncpa [#allocation3], 1 }
 0x18a   :  { %842 = vsyncpa [#allocation6], 1 }
 0x18b   :  { %843 = vsyncpa [#allocation9], 1 }
 0x18c   :  { %844 = vsyncpa [#allocation4], 1 }

// kernel: _forward.1
= control target key start
LH: loop header
LB: loop body
LE: loop exit
PB: predicated region body
PF: predicated region fallthrough
CT: control target
= control target key end

     0   :  { %11 = vsyncpa [#allocation3], 0  ;;  %s769_s0 = inlined_call_operand.vmem [shape: f32[8,64], index: 0, kind: input, shape index: {}]   ;;  %s770_s1 = inlined_call_operand.vmem [shape: f32[8,56], index: 1, kind: input, shape index: {}]   ;;  %s771_s2 = inlined_call_operand.hbm [shape: bf16[64,256], index: 2, kind: input, shape index: {}]   ;;  %s772_s3 = inlined_call_operand.hbm [shape: f32[56,256], index: 3, kind: input, shape index: {}]   ;;  %s773_s4 = inlined_call_operand.hbm [shape: bf16[128,128], index: 4, kind: input, shape index: {}]   ;;  %s774_s5 = inlined_call_operand.hbm [shape: bf16[128,128], index: 5, kind: input, shape index: {}]   ;;  %s775_s6 = inlined_call_operand.hbm [shape: f32[8,128], index: 6, kind: output, shape index: {}]  }
   0x1   :  { %12 = vsyncpa [#allocation6], 0 }
   0x2   :  { %13 = vsyncpa [#allocation9], 0  ;;  %s36_s23 = sshll.u32 %s772_s3, 4  ;;  %s37_s23 = int_to_ptr.hbm [resolvable:$true] %s36_s23 }
   0x3   :  { %14 = vsyncpa [#allocation4], 0  ;;  %s702_s24 = smov [#allocation5]   ;;  %s23_s28 = sshll.u32 %s771_s2, 4  ;;  %s24_s28 = int_to_ptr.hbm [resolvable:$true] %s23_s28 }
   0x4   :  { %s38_s25 = sshll.u32 %s702_s24, 4  ;;  %s703_s29 = smov 256   ;;  %s39_s25 = int_to_ptr.vmem [resolvable:$true] %s38_s25 }
   0x5   :  { %s704_s30 = smov 16   ;;  %s705_s7 = smov [#allocation2]  }
   0x6   :  { %44 = dma.hbm_to_vmem [thread:$0]  %s37_s23, 1792, %s39_s25, [#allocation6], %s703_s29, %s703_s29, %s704_s30  }
   0x7   :  { %s25_s8 = sshll.u32 %s705_s7, 4  ;;  %s706_s9 = smov 128   ;;  %s26_s8 = int_to_ptr.vmem [resolvable:$true] %s25_s8 }
   0x8   :  { %s707_s10 = smov 8   ;;  %s49_s12 = sshll.u32 %s773_s4, 4  ;;  %s50_s12 = int_to_ptr.hbm [resolvable:$true] %s49_s12 }
   0x9   :  { %31 = dma.hbm_to_vmem [thread:$0]  %s24_s28, 1024, %s26_s8, [#allocation3], %s706_s9, %s706_s9, %s707_s10  }
   0xa   :  { %s708_s13 = smov [#allocation7]   ;;  %s62_s16 = sshll.u32 %s774_s5, 4  ;;  %s63_s16 = int_to_ptr.hbm [resolvable:$true] %s62_s16 }
   0xb   :  { %s51_s14 = sshll.u32 %s708_s13, 4  ;;  %s709_s17 = smov 64   ;;  %s52_s14 = int_to_ptr.vmem [resolvable:$true] %s51_s14 }
   0xc   :  { %s710_s18 = smov 4   ;;  %s711_s19 = smov [#allocation8]  }
   0xd   :  { %57 = dma.hbm_to_vmem [thread:$0]  %s50_s12, 1024, %s52_s14, [#allocation6], %s709_s17, %s709_s17, %s710_s18  }
   0xe   :  { %s64_s20 = sshll.u32 %s711_s19, 4  ;;  %s65_s20 = int_to_ptr.vmem [resolvable:$true] %s64_s20 }
   0xf   :  { %70 = dma.hbm_to_vmem [thread:$0]  %s63_s16, 1024, %s65_s20, [#allocation9], %s709_s17, %s709_s17, %s710_s18  }
  0x10   :  { %694 = dma.done.wait [#allocation3], 1024  }
  0x11   :  { %695 = vsyncadd [#allocation3], 4294966272 }
  0x12   :  { %696 = dma.done.wait [#allocation6], 2816  }
  0x13   :  { %697 = vsyncadd [#allocation6], 4294964480 }
  0x14   :  { %698 = dma.done.wait [#allocation9], 1024  }
  0x15   :  { %699 = vsyncadd [#allocation9], 4294966272  ;;  %v463_v0 = vld [vmem:[#allocation2 + $0x30] sm:$0xf]  ;;  %v544_v1 = vld [vmem:[#allocation2 + $0x34] sm:$0xf0]  ;;  %v231_v61 = vlaneseq }
  0x16   :  { %v543_v2 = vld [vmem:[#allocation2 + $0x34] sm:$0xf]  ;;  %v464_v3 = vor.u32 %v544_v1, %v463_v0  ;;  %v465_v4 = vld [vmem:[#allocation2 + $0x38] sm:$0xf0]  ;;  %v455_v5 = vld [vmem:[#allocation2 + $0x20] sm:$0xf] }
  0x17   :  { %v542_v6 = vld [vmem:[#allocation2 + $0x24] sm:$0xf0]  ;;  %v468_v7 = vor.u32 %v543_v2, %v465_v4  ;;  %v541_v8 = vld [vmem:[#allocation2 + $0x24] sm:$0xf]  ;;  %v457_v9 = vld [vmem:[#allocation2 + $0x28] sm:$0xf0] }
  0x18   :  { %146 = vmatpush.bf16.msra.mxu0 %v464_v3  ;;  %v456_v10 = vor.u32 %v542_v6, %v455_v5  ;;  %v460_v11 = vor.u32 %v541_v8, %v457_v9  ;;  %v447_v12 = vld [vmem:[#allocation2 + $0x10] sm:$0xf]  ;;  %v540_v13 = vld [vmem:[#allocation2 + $0x14] sm:$0xf0]  ;;  %v539_v14 = vld [vmem:[#allocation2 + $0x14] sm:$0xf] }
  0x19   :  { %159 = vmatpush.bf16.msra.mxu1 %v468_v7  ;;  %v449_v15 = vld [vmem:[#allocation2 + $0x18] sm:$0xf0]  ;;  %v448_v16 = vor.u32 %v540_v13, %v447_v12  ;;  %v439_v18 = vld [vmem:[#allocation2] sm:$0xf]  ;;  %v538_v19 = vld [vmem:[#allocation2 + $0x4] sm:$0xf0] }
  0x1a   :  { %v452_v17 = vor.u32 %v539_v14, %v449_v15  ;;  %v537_v20 = vld [vmem:[#allocation2 + $0x4] sm:$0xf]  ;;  %v441_v21 = vld [vmem:[#allocation2 + $0x8] sm:$0xf0]  ;;  %v440_v22 = vor.u32 %v538_v19, %v439_v18  ;;  %vm138_vm0 = vcmask 523264   ;;  %v179_v28 = vld [vmem:[#allocation5 + $0x50] sm:$0xff] }
  0x1b   :  { %v88_v23 = vld [vmem:[%s769_s0] sm:$0xff]  ;;  %v444_v24 = vor.u32 %v537_v20, %v441_v21  ;;  %v182_v27 = vld [vmem:[#allocation5 + $0x68] sm:$0xff]  ;;  %v180_v29 = vld [vmem:[#allocation5 + $0x58] sm:$0xff]  ;;  %vm183_vm1 = vcmask 457728   ;;  %v232_v63 = vand.u32 127, %v231_v61  ;;  %s425_s25 = sshll.u32 %s775_s6, 4  ;;  %s426_s25 = int_to_ptr.hbm [resolvable:$true] %s425_s25 }
  0x1c   :  { %147 = vmatpush.bf16.msra.mxu0 %v456_v10  ;;  %v181_v25 = vld [vmem:[#allocation5 + $0x60] sm:$0xff]  ;;  %v89_v26 = vpack.c.bf16 %v88_v23, %v88_v23  ;;  %v178_v31 = vld [vmem:[#allocation5 + $0x48] sm:$0xff]  ;;  %v175_v32 = vld [vmem:[#allocation5 + $0x30] sm:$0xff] }
  0x1d   :  { %160 = vmatpush.bf16.msra.mxu1 %v460_v11  ;;  %v177_v30 = vld [vmem:[#allocation5 + $0x40] sm:$0xff]  ;;  %v176_v33 = vld [vmem:[#allocation5 + $0x38] sm:$0xff]  ;;  %v174_v35 = vld [vmem:[#allocation5 + $0x28] sm:$0xff]  ;;  %vm236_vm2 = vcmp.lt.s32.totalorder %v232_v63, 33 }
  0x1e   :  { %v173_v34 = vld [vmem:[#allocation5 + $0x20] sm:$0xff]  ;;  %v171_v36 = vld [vmem:[#allocation5 + $0x10] sm:$0xff]  ;;  %v172_v37 = vld [vmem:[#allocation5 + $0x18] sm:$0xff] }
  0x1f   :  { %v169_v38 = vld [vmem:[#allocation5] sm:$0xff]  ;;  %v170_v39 = vld [vmem:[#allocation5 + $0x8] sm:$0xff]  ;;  %v558_v45 = vld [vmem:[#allocation8 + $0x28] sm:$0xff] }
  0x20   :  { %148 = vmatpush.bf16.msra.mxu0 %v448_v16  ;;  %v168_v40 = vld [vmem:[%s770_s1] sm:$0xff]  ;;  %v560_v41 = vld [vmem:[#allocation8 + $0x38] sm:$0xff]  ;;  %v550_v46 = vld [vmem:[#allocation7 + $0x28] sm:$0xff]  ;;  %s712_s1 = smov [#allocation10]  }
  0x21   :  { %161 = vmatpush.bf16.msra.mxu1 %v452_v17  ;;  %v552_v42 = vld [vmem:[#allocation7 + $0x38] sm:$0xff]  ;;  %332 = vmatpush.bf16.msra.mxu2 %v560_v41  ;;  %v559_v43 = vld [vmem:[#allocation8 + $0x30] sm:$0xff]  ;;  %v557_v47 = vld [vmem:[#allocation8 + $0x20] sm:$0xff]  ;;  %s423_s22 = sshll.u32 %s712_s1, 4  ;;  %s424_s22 = int_to_ptr.vmem [resolvable:$true] %s423_s22 }
  0x22   :  { %393 = vmatpush.bf16.msra.mxu3 %v552_v42  ;;  %v551_v44 = vld [vmem:[#allocation7 + $0x30] sm:$0xff]  ;;  %v549_v48 = vld [vmem:[#allocation7 + $0x20] sm:$0xff]  ;;  %v556_v49 = vld [vmem:[#allocation8 + $0x18] sm:$0xff] }
  0x23   :  { %v548_v50 = vld [vmem:[#allocation7 + $0x18] sm:$0xff]  ;;  %v555_v51 = vld [vmem:[#allocation8 + $0x10] sm:$0xff]  ;;  %v554_v53 = vld [vmem:[#allocation8 + $0x8] sm:$0xff] }
  0x24   :  { %149 = vmatpush.bf16.msra.mxu0 %v440_v22  ;;  %v547_v52 = vld [vmem:[#allocation7 + $0x10] sm:$0xff]  ;;  %v546_v54 = vld [vmem:[#allocation7 + $0x8] sm:$0xff]  ;;  %v553_v57 = vld [vmem:[#allocation8] sm:$0xff] }
  0x25   :  { %162 = vmatpush.bf16.msra.mxu1 %v444_v24  ;;  %333 = vmatpush.bf16.msra.mxu2 %v559_v43  ;;  %v545_v58 = vld [vmem:[#allocation7] sm:$0xff] }
  0x26   :  { %394 = vmatpush.bf16.msra.mxu3 %v551_v44 }
  0x27   :  { %469 = vmatmul.msk.bf16.vlgmr.msra.gmra.mxu0 %vm138_vm0, %v89_v26 }
  0x28   :  { %196 = vmatpush.msrb.mxu0 %v181_v25  ;;  %470 = vmatmul.msk.bf16.vlgmr.msra.gmra.mxu1 %vm138_vm0, %v89_v26 }
  0x29   :  { %216 = vmatpush.msrb.mxu1 %v182_v27  ;;  %334 = vmatpush.bf16.msra.mxu2 %v558_v45 }
  0x2a   :  { %197 = vmatpush.msrb.mxu0 %v179_v28  ;;  %395 = vmatpush.bf16.msra.mxu3 %v550_v46 }
  0x2b   :  { %217 = vmatpush.msrb.mxu1 %v180_v29 }
  0x2c   :  { %198 = vmatpush.msrb.mxu0 %v177_v30 }
  0x2d   :  { %218 = vmatpush.msrb.mxu1 %v178_v31  ;;  %335 = vmatpush.bf16.msra.mxu2 %v557_v47 }
  0x2e   :  { %199 = vmatpush.msrb.mxu0 %v175_v32  ;;  %396 = vmatpush.bf16.msra.mxu3 %v549_v48 }
  0x2f   :  { %219 = vmatpush.msrb.mxu1 %v176_v33 }
  0x30   :  { %200 = vmatpush.msrb.mxu0 %v173_v34 }
  0x31   :  { %220 = vmatpush.msrb.mxu1 %v174_v35  ;;  %336 = vmatpush.bf16.msra.mxu2 %v556_v49 }
  0x32   :  { %201 = vmatpush.msrb.mxu0 %v171_v36  ;;  %397 = vmatpush.bf16.msra.mxu3 %v548_v50 }
  0x33   :  { %221 = vmatpush.msrb.mxu1 %v172_v37 }
  0x34   :  { %202 = vmatpush.msrb.mxu0 %v169_v38 }
  0x35   :  { %222 = vmatpush.msrb.mxu1 %v170_v39  ;;  %337 = vmatpush.bf16.msra.mxu2 %v555_v51 }
  0x36   :  { %398 = vmatpush.bf16.msra.mxu3 %v547_v52 }
  0x37   :  { %471 = vmatmul.msk.f32.vlgmr.msrb.gmra.mxu0 %vm183_vm1, %v168_v40 }
  0x38   :  { %472 = vmatmul.msk.f32.vlgmr.msrb.gmra.mxu1 %vm183_vm1, %v168_v40 }
  0x39   :  { %338 = vmatpush.bf16.msra.mxu2 %v554_v53 }
  0x3a   :  { %399 = vmatpush.bf16.msra.mxu3 %v546_v54 }
  0x3d   :  { %339 = vmatpush.bf16.msra.mxu2 %v553_v57 }
  0x3e   :  { %400 = vmatpush.bf16.msra.mxu3 %v545_v58 }
  0xa4   :  { %v151_v55 = vpop.f32.mrf.mxu0 }
  0xa5   :  { %v164_v56 = vpop.f32.mrf.mxu1 }
  0xac   :  { %v153_v59 = vpop.f32.mrf.mxu0 }
  0xad   :  { %v166_v60 = vpop.f32.mrf.mxu1 }
  0xb4   :  { %v204_v62 = vpop.f32.mrf.mxu0 }
  0xb5   :  { %v227_v0 = vadd.f32 1e-10, %v204_v62  ;;  %v224_v1 = vpop.f32.mrf.mxu1 }
  0xb6   :  { %v229_v2 = vmul.f32 %v224_v1, %v224_v1  ;;  %v243_v10 = vmul.f32 %v224_v1, %v164_v56  ;;  %v247_v11 = vmul.f32 %v224_v1, %v151_v55 }
  0xb7   :  { %v228_v3 = vmul.f32 %v227_v0, %v227_v0  ;;  %v242_v7 = vmul.f32 %v227_v0, %v151_v55  ;;  %v246_v8 = vmul.f32 %v227_v0, %v164_v56 }
  0xb9   :  { %v230_v4 = vadd.f32 %v229_v2, %v228_v3  ;;  %v244_v13 = vadd.f32 %v243_v10, %v242_v7  ;;  %v248_v14 = vsub.f32 %v246_v8, %v247_v11 }
  0xbb   :  { %v237_v5 = vsel %vm236_vm2, %v230_v4, 1.0 }
  0xbc   :  { %572 = vrcp.f32 %v237_v5 }
  0xc2   :  { %v573_v6 = vpop.eup %572 }
  0xc3   :  { %v239_v9 = vmul.f32 %v573_v6, %v237_v5 }
  0xc5   :  { %v240_v12 = vsub.f32 2.0, %v239_v9 }
  0xc7   :  { %v241_v15 = vmul.f32 %v573_v6, %v240_v12 }
  0xc9   :  { %v249_v16 = vmul.f32 %v248_v14, %v241_v15  ;;  %v245_v17 = vmul.f32 %v244_v13, %v241_v15 }
  0xcb   :  { %v267_v18 = vpack.c.bf16 %v249_v16, %v249_v16  ;;  %v250_v19 = vpack.c.bf16 %v245_v17, %v245_v17 }
  0xcd   :  { %340 = vmatmul.bf16.vlgmr.msra.gmra.mxu2 %v267_v18  ;;  %401 = vmatmul.bf16.vlgmr.msra.gmra.mxu3 %v250_v19 }
 0x150   :  { %v341_v20 = vpop.f32.mrf.mxu2  ;;  %v402_v21 = vpop.f32.mrf.mxu3 }
 0x151   :  { %v403_v22 = vadd.f32 %v402_v21, %v341_v20 }
 0x153   :  { %410 = vst [vmem:[#allocation10] sm:$0xff] %v403_v22 }
 0x154   :  { %428 = dma.vmem_to_hbm [thread:$0]  %s424_s22, 128, %s426_s25, [#allocation4]  }
 0x158   :  { %v343_v23 = vpop.f32.mrf.mxu2  ;;  %v404_v24 = vpop.f32.mrf.mxu3 }
 0x159   :  { %700 = dma.done.wait [#allocation4], 128  }
 0x15a   :  { %701 = vsyncadd [#allocation4], 4294967168 }
 0x15b   :  { %433 = vsyncpa [#allocation3], 1 }
 0x15c   :  { %434 = vsyncpa [#allocation6], 1 }
 0x15d   :  { %435 = vsyncpa [#allocation9], 1 }
 0x15e   :  { %436 = vsyncpa [#allocation4], 1 }

</bundles_post_ra>
